<compile_context>
chip_gen: v7x
topology: tpu7x:2x2x1
jax: 0.10.0
libtpu: 0.0.40
codegen_flags: <defaults>
</compile_context>

<pallas_src>
import jax
import jax.numpy as jnp
from jax.experimental import pallas as pl
from jax.experimental.pallas import tpu as pltpu


K = 784        # 28 * 28, used un-padded (full-dim block is legal)
H1 = 128
H2_PAD = 128   # 64 padded up to 128
N_PAD = 128    # 10 padded up to 128 (lane-dense output stores)


def mlp_kernel(x_ref, w1_ref, b1_ref, w2_ref, b2_ref, w3_ref, b3_ref, o_ref):
    # x_ref: (TB, 784) bf16     w1: (784, 128) bf16   b1: (1, 128) f32
    # w2: (128, 128) bf16       b2: (1, 128) f32
    # w3: (128, 128) bf16       b3: (1, 128) f32      o_ref: (TB, 128) bf16
    x = x_ref[...]  # already bf16 (cast done once in the wrapper)

    h1 = jnp.dot(x, w1_ref[...], preferred_element_type=jnp.float32) + b1_ref[...]
    h1 = jnp.maximum(h1, 0.0)

    h2 = jnp.dot(h1.astype(jnp.bfloat16), w2_ref[...],
                 preferred_element_type=jnp.float32) + b2_ref[...]
    h2 = jnp.maximum(h2, 0.0)

    out = jnp.dot(h2.astype(jnp.bfloat16), w3_ref[...],
                  preferred_element_type=jnp.float32) + b3_ref[...]
    o_ref[...] = out.astype(o_ref.dtype)


def _round_up(n, m):
    return (n + m - 1) // m * m


def prepare_params(params):
    """One-time param prep (pad to 128-lane widths, cast MXU operands to bf16).

    Call once and reuse the result; this keeps the 6 small pad/cast passes off
    the per-forward critical path.
    """
    w1, b1, w2, b2, w3, b3 = params
    w1_p = jnp.asarray(w1, jnp.float32).astype(jnp.bfloat16)              # (784, 128)
    b1_p = jnp.reshape(b1, (1, -1)).astype(jnp.float32)                   # (1, 128)
    w2_p = (jnp.zeros((H1, H2_PAD), jnp.float32)
            .at[:, :w2.shape[1]].set(w2).astype(jnp.bfloat16))            # (128, 128)
    b2_p = jnp.zeros((1, H2_PAD), jnp.float32).at[:, :b2.shape[-1]].set(
        jnp.reshape(b2, (1, -1)))
    w3_p = (jnp.zeros((H2_PAD, N_PAD), jnp.float32)
            .at[:w3.shape[0], :w3.shape[1]].set(w3).astype(jnp.bfloat16)) # (128, 128)
    b3_p = jnp.zeros((1, N_PAD), jnp.float32).at[:, :b3.shape[-1]].set(
        jnp.reshape(b3, (1, -1)))
    return (w1_p, b1_p, w2_p, b2_p, w3_p, b3_p)


def custom_nn_forward(x, prepared_params, max_tile_rows=2048):
    """x: [B, 1, 28, 28] (or [B, 784]) float.  Returns logits [B, 10] f32."""
    w1_p, b1_p, w2_p, b2_p, w3_p, b3_p = prepared_params
    B = x.shape[0]
    x_flat = x.reshape(B, -1)  # matches torch x.view(x.size(0), -1)
    assert x_flat.shape[1] == K

    # Batch tile: multiple of 16 rows (bf16 native sublane tiling), capped at
    # max_tile_rows, and chosen so the grid has >= 2 steps whenever B >= 32
    # (keeps both v7x TensorCores busy via the "parallel" axis).
    TB = max(16, min(max_tile_rows, _round_up(-(-B // 2), 16)))
    B_pad = _round_up(B, TB)

    # Single bf16 cast of the streamed input; pad only batch rows if needed.
    x_in = x_flat.astype(jnp.bfloat16)
    if B_pad != B:
        x_in = jnp.zeros((B_pad, K), jnp.bfloat16).at[:B].set(x_in)

    resident = lambda shape: pl.BlockSpec(shape, lambda i: (0, 0))

    out = pl.pallas_call(
        mlp_kernel,
        out_shape=jax.ShapeDtypeStruct((B_pad, N_PAD), jnp.bfloat16),
        grid=(B_pad // TB,),
        in_specs=[
            pl.BlockSpec((TB, K), lambda i: (i, 0)),       # streamed bf16 x tiles
            resident(w1_p.shape), resident(b1_p.shape),    # VMEM-resident params
            resident(w2_p.shape), resident(b2_p.shape),
            resident(w3_p.shape), resident(b3_p.shape),
        ],
        out_specs=pl.BlockSpec((TB, N_PAD), lambda i: (i, 0)),
        compiler_params=pltpu.CompilerParams(
            dimension_semantics=("parallel",),   # megacore sharding on v7x
            vmem_limit_bytes=32 << 20,           # safe on v7x (64 MiB physical)
        ),
    )(x_in, w1_p, b1_p, w2_p, b2_p, w3_p, b3_p)

    return out[:B, :10].astype(jnp.float32)


def init_params(key):
    """Deterministic init mirroring nn.Linear shapes (stored as [in, out])."""
    k1, k2, k3, k4, k5, k6 = jax.random.split(key, 6)

    def linear(kw, kb, fan_in, fan_out):
        bound = 1.0 / jnp.sqrt(fan_in)
        w = jax.random.uniform(kw, (fan_in, fan_out), jnp.float32, -bound, bound)
        b = jax.random.uniform(kb, (1, fan_out), jnp.float32, -bound, bound)
        return w, b

    w1, b1 = linear(k1, k2, 784, 128)
    w2, b2 = linear(k3, k4, 128, 64)
    w3, b3 = linear(k5, k6, 64, 10)
    return (w1, b1, w2, b2, w3, b3)


if __name__ == "__main__":
    key = jax.random.PRNGKey(0)
    pkey, xkey = jax.random.split(key)
    params = init_params(pkey)
    prepared = prepare_params(params)          # one-time, off the forward path

    # Small MNIST-shaped batch: [B, 1, 28, 28]
    x = jax.random.normal(xkey, (8, 1, 28, 28), jnp.float32)

    out = custom_nn_forward(x, prepared)
    out = jax.block_until_ready(out)

    # Pure-JAX f32 reference (kernel uses bf16 MXU operands + f32 accumulation
    # and a bf16 output store, so compare with a bf16-appropriate tolerance).
    w1, b1, w2, b2, w3, b3 = params
    xf = x.reshape(x.shape[0], -1)
    ref = jnp.maximum(xf @ w1 + b1, 0.0)
    ref = jnp.maximum(ref @ w2 + b2, 0.0)
    ref = ref @ w3 + b3

    assert out.shape == (8, 10)
    assert jnp.allclose(out, ref, atol=7.5e-2, rtol=5e-2), (
        float(jnp.max(jnp.abs(out - ref))))

    print("KERNEL_OK")
</pallas_src>

<mosaic_0001>
module attributes {stable_mosaic.version = 11 : i64} {
  func.func @mlp_kernel(%arg0: i32, %arg1: memref<16x784xbf16, #tpu.memory_space<vmem>>, %arg2: memref<784x128xbf16, #tpu.memory_space<vmem>>, %arg3: memref<1x128xf32, #tpu.memory_space<vmem>>, %arg4: memref<128x128xbf16, #tpu.memory_space<vmem>>, %arg5: memref<1x128xf32, #tpu.memory_space<vmem>>, %arg6: memref<128x128xbf16, #tpu.memory_space<vmem>>, %arg7: memref<1x128xf32, #tpu.memory_space<vmem>>, %arg8: memref<16x128xbf16, #tpu.memory_space<vmem>>) attributes {dimension_semantics = [#tpu.dimension_semantics<parallel>], iteration_bounds = array<i64: 1>, scalar_prefetch = 0 : i64, scratch_operands = 0 : i64, tpu.core_type = #tpu.core_type<tc>, window_params = [{transform_indices = @transform_0, window_bounds = array<i64: 16, 784>}, {pipeline_mode = #tpu.pipeline_mode<synchronous>, transform_indices = @transform_1, window_bounds = array<i64: 784, 128>}, {pipeline_mode = #tpu.pipeline_mode<synchronous>, transform_indices = @transform_2, window_bounds = array<i64: 1, 128>}, {pipeline_mode = #tpu.pipeline_mode<synchronous>, transform_indices = @transform_3, window_bounds = array<i64: 128, 128>}, {pipeline_mode = #tpu.pipeline_mode<synchronous>, transform_indices = @transform_4, window_bounds = array<i64: 1, 128>}, {pipeline_mode = #tpu.pipeline_mode<synchronous>, transform_indices = @transform_5, window_bounds = array<i64: 128, 128>}, {pipeline_mode = #tpu.pipeline_mode<synchronous>, transform_indices = @transform_6, window_bounds = array<i64: 1, 128>}, {transform_indices = @transform_7, window_bounds = array<i64: 16, 128>}]} {
    %c0 = arith.constant 0 : index
    %c0_0 = arith.constant 0 : index
    %0 = vector.load %arg1[%c0, %c0_0] : memref<16x784xbf16, #tpu.memory_space<vmem>>, vector<16x784xbf16>
    %c0_1 = arith.constant 0 : index
    %c0_2 = arith.constant 0 : index
    %1 = vector.load %arg2[%c0_1, %c0_2] : memref<784x128xbf16, #tpu.memory_space<vmem>>, vector<784x128xbf16>
    %cst = arith.constant dense<0.000000e+00> : vector<16x128xf32>
    %2 = tpu.matmul %0, %1, %cst {dimension_numbers = #tpu.dot_dimension_numbers<[1], [0], [0], [1], [0, 0, 1, 1], [], []>} : vector<16x784xbf16>, vector<784x128xbf16>, vector<16x128xf32> -> vector<16x128xf32>
    %c0_3 = arith.constant 0 : index
    %c0_4 = arith.constant 0 : index
    %3 = vector.load %arg3[%c0_3, %c0_4] : memref<1x128xf32, #tpu.memory_space<vmem>>, vector<1x128xf32>
    %4 = vector.broadcast %3 : vector<1x128xf32> to vector<16x128xf32>
    %5 = arith.addf %2, %4 : vector<16x128xf32>
    %cst_5 = arith.constant 0.000000e+00 : f32
    %6 = vector.broadcast %cst_5 : f32 to vector<16x128xf32>
    %7 = arith.maximumf %5, %6 : vector<16x128xf32>
    %8 = arith.truncf %7 : vector<16x128xf32> to vector<16x128xbf16>
    %c0_6 = arith.constant 0 : index
    %c0_7 = arith.constant 0 : index
    %9 = vector.load %arg4[%c0_6, %c0_7] : memref<128x128xbf16, #tpu.memory_space<vmem>>, vector<128x128xbf16>
    %cst_8 = arith.constant dense<0.000000e+00> : vector<16x128xf32>
    %10 = tpu.matmul %8, %9, %cst_8 {dimension_numbers = #tpu.dot_dimension_numbers<[1], [0], [0], [1], [0, 0, 1, 1], [], []>} : vector<16x128xbf16>, vector<128x128xbf16>, vector<16x128xf32> -> vector<16x128xf32>
    %c0_9 = arith.constant 0 : index
    %c0_10 = arith.constant 0 : index
    %11 = vector.load %arg5[%c0_9, %c0_10] : memref<1x128xf32, #tpu.memory_space<vmem>>, vector<1x128xf32>
    %12 = vector.broadcast %11 : vector<1x128xf32> to vector<16x128xf32>
    %13 = arith.addf %10, %12 : vector<16x128xf32>
    %cst_11 = arith.constant 0.000000e+00 : f32
    %14 = vector.broadcast %cst_11 : f32 to vector<16x128xf32>
    %15 = arith.maximumf %13, %14 : vector<16x128xf32>
    %16 = arith.truncf %15 : vector<16x128xf32> to vector<16x128xbf16>
    %c0_12 = arith.constant 0 : index
    %c0_13 = arith.constant 0 : index
    %17 = vector.load %arg6[%c0_12, %c0_13] : memref<128x128xbf16, #tpu.memory_space<vmem>>, vector<128x128xbf16>
    %cst_14 = arith.constant dense<0.000000e+00> : vector<16x128xf32>
    %18 = tpu.matmul %16, %17, %cst_14 {dimension_numbers = #tpu.dot_dimension_numbers<[1], [0], [0], [1], [0, 0, 1, 1], [], []>} : vector<16x128xbf16>, vector<128x128xbf16>, vector<16x128xf32> -> vector<16x128xf32>
    %c0_15 = arith.constant 0 : index
    %c0_16 = arith.constant 0 : index
    %19 = vector.load %arg7[%c0_15, %c0_16] : memref<1x128xf32, #tpu.memory_space<vmem>>, vector<1x128xf32>
    %20 = vector.broadcast %19 : vector<1x128xf32> to vector<16x128xf32>
    %21 = arith.addf %18, %20 : vector<16x128xf32>
    %22 = arith.truncf %21 : vector<16x128xf32> to vector<16x128xbf16>
    %c0_17 = arith.constant 0 : index
    %c0_18 = arith.constant 0 : index
    %23 = vector.load %arg8[%c0_17, %c0_18] : memref<16x128xbf16, #tpu.memory_space<vmem>>, vector<16x128xbf16>
    tpu.vector_store %arg8[%c0_17, %c0_18], %22 {strides = array<i32>} : memref<16x128xbf16, #tpu.memory_space<vmem>>, vector<16x128xbf16>,
    return
  }
  func.func @transform_0(%arg0: i32) -> (i32, i32) {
    %c0_i32 = arith.constant 0 : i32
    %c0_i32_0 = arith.constant 0 : i32
    return %arg0, %c0_i32 : i32, i32
  }
  func.func @transform_1(%arg0: i32) -> (i32, i32) {
    %c0_i32 = arith.constant 0 : i32
    %c0_i32_0 = arith.constant 0 : i32
    %c0_i32_1 = arith.constant 0 : i32
    return %c0_i32, %c0_i32_0 : i32, i32
  }
  func.func @transform_2(%arg0: i32) -> (i32, i32) {
    %c0_i32 = arith.constant 0 : i32
    %c0_i32_0 = arith.constant 0 : i32
    %c0_i32_1 = arith.constant 0 : i32
    return %c0_i32, %c0_i32_0 : i32, i32
  }
  func.func @transform_3(%arg0: i32) -> (i32, i32) {
    %c0_i32 = arith.constant 0 : i32
    %c0_i32_0 = arith.constant 0 : i32
    %c0_i32_1 = arith.constant 0 : i32
    return %c0_i32, %c0_i32_0 : i32, i32
  }
  func.func @transform_4(%arg0: i32) -> (i32, i32) {
    %c0_i32 = arith.constant 0 : i32
    %c0_i32_0 = arith.constant 0 : i32
    %c0_i32_1 = arith.constant 0 : i32
    return %c0_i32, %c0_i32_0 : i32, i32
  }
  func.func @transform_5(%arg0: i32) -> (i32, i32) {
    %c0_i32 = arith.constant 0 : i32
    %c0_i32_0 = arith.constant 0 : i32
    %c0_i32_1 = arith.constant 0 : i32
    return %c0_i32, %c0_i32_0 : i32, i32
  }
  func.func @transform_6(%arg0: i32) -> (i32, i32) {
    %c0_i32 = arith.constant 0 : i32
    %c0_i32_0 = arith.constant 0 : i32
    %c0_i32_1 = arith.constant 0 : i32
    return %c0_i32, %c0_i32_0 : i32, i32
  }
  func.func @transform_7(%arg0: i32) -> (i32, i32) {
    %c0_i32 = arith.constant 0 : i32
    %c0_i32_0 = arith.constant 0 : i32
    return %arg0, %c0_i32 : i32, i32
  }
}

</mosaic_0001>

<bundles_post_ra>
// kernel: tpu_custom_call.1
= control target key start
LH: loop header
LB: loop body
LE: loop exit
PB: predicated region body
PF: predicated region fallthrough
CT: control target
= control target key end

     0   :  { %12 = vsyncpa [#allocation3], 0  ;;  %s1535_s0 = inlined_call_operand.hbm [shape: bf16[16,784], index: 0, kind: input, shape index: {}]   ;;  %s1536_s1 = inlined_call_operand.hbm [shape: bf16[784,128], index: 1, kind: input, shape index: {}]   ;;  %s1537_s2 = inlined_call_operand.vmem [shape: f32[1,128], index: 2, kind: input, shape index: {}]   ;;  %s1538_s3 = inlined_call_operand.hbm [shape: bf16[128,128], index: 3, kind: input, shape index: {}]   ;;  %s1539_s4 = inlined_call_operand.vmem [shape: f32[1,128], index: 4, kind: input, shape index: {}]   ;;  %s1540_s5 = inlined_call_operand.hbm [shape: bf16[128,128], index: 5, kind: input, shape index: {}]   ;;  %s1541_s6 = inlined_call_operand.vmem [shape: f32[1,128], index: 6, kind: input, shape index: {}]   ;;  %s1542_s7 = inlined_call_operand.hbm [shape: bf16[16,128], index: 7, kind: output, shape index: {}]  }
   0x1   :  { %13 = vsyncpa [#allocation6], 0 }
   0x2   :  { %14 = vsyncpa [#allocation9], 0 }
   0x3   :  { %15 = vsyncpa [#allocation4], 0  ;;  %s1373_s24 = smov [#allocation5]   ;;  %s1255_s28 = scalar_lea.hbm %s1536_s1, 6272 }
   0x4   :  { %s33_s25 = sshll.u32 %s1373_s24, 4  ;;  %p1256_p0 = scmp.ne.s32.totalorder %s1536_s1, %s1255_s28  ;;  %s34_s25 = int_to_ptr.vmem [resolvable:$true] %s33_s25 }
   0x5   :  { %p1259_p1 = scmp.lt.u32.totalorder %s1255_s28, %s1536_s1 }
   0x7   :  { %p1261_p2 = pnand %p1259_p1, %p1256_p0 }
   0x9   :  { %1264 = shalt.err (!%p1261_p2)
}
   0xa   :  { %s1265_s10 = scalar_lea.vmem %s34_s25, 6272  ;;  %p1270_p4 = scmp.lt.s32.totalorder %s34_s25, %s34_s25 }
   0xb   :  { %p1266_p3 = scmp.ne.s32.totalorder %s34_s25, %s1265_s10  ;;  %p1271_p5 = scmp.lt.s32.totalorder %s1265_s10, %s1265_s10 }
   0xd   :  { %p1272_p6 = por %p1271_p5, %p1270_p4 }
   0xf   :  { %p1273_p7 = pnand %p1272_p6, %p1266_p3 }
  0x11   :  { %1276 = shalt.err (!%p1273_p7)
}
  0x12   :  { %s1374_s11 = smov 64   ;;  %s1375_s12 = smov 4  }
  0x13   :  { %39 = dma.hbm_to_vmem [thread:$0]  %s1536_s1, 6272, %s34_s25, [#allocation6], %s1374_s11, %s1374_s11, %s1375_s12  }
  0x14   :  { %s1376_s15 = smov [#allocation2]   ;;  %s1277_s19 = scalar_lea.hbm %s1535_s0, 896 }
  0x15   :  { %s21_s16 = sshll.u32 %s1376_s15, 4  ;;  %p1278_p8 = scmp.ne.s32.totalorder %s1535_s0, %s1277_s19  ;;  %s22_s16 = int_to_ptr.vmem [resolvable:$true] %s21_s16 }
  0x16   :  { %p1281_p9 = scmp.lt.u32.totalorder %s1277_s19, %s1535_s0 }
  0x18   :  { %p1283_p10 = pnand %p1281_p9, %p1278_p8 }
  0x1a   :  { %1286 = shalt.err (!%p1283_p10)
}
  0x1b   :  { %s1287_s24 = scalar_lea.vmem %s22_s16, 896  ;;  %p1292_p12 = scmp.lt.s32.totalorder %s22_s16, %s22_s16 }
  0x1c   :  { %p1288_p11 = scmp.ne.s32.totalorder %s22_s16, %s1287_s24  ;;  %p1293_p13 = scmp.lt.s32.totalorder %s1287_s24, %s1287_s24 }
  0x1e   :  { %p1294_p0 = por %p1293_p13, %p1292_p12 }
  0x20   :  { %p1295_p1 = pnand %p1294_p0, %p1288_p11 }
  0x22   :  { %1298 = shalt.err (!%p1295_p1)
}
  0x23   :  { %s1377_s1 = smov 448   ;;  %s1378_s25 = smov 28  }
  0x24   :  { %27 = dma.hbm_to_vmem [thread:$0]  %s1535_s0, 896, %s22_s16, [#allocation3], %s1377_s1, %s1377_s1, %s1378_s25  }
  0x25   :  { %s1379_s28 = smov [#allocation7]   ;;  %s1380_s30 = smov [#allocation8]  }
  0x26   :  { %s47_s29 = sshll.u32 %s1379_s28, 4  ;;  %s61_s8 = sshll.u32 %s1380_s30, 4  ;;  %s48_s29 = int_to_ptr.vmem [resolvable:$true] %s47_s29  ;;  %s1451_s8 = int_to_ptr.vmem [resolvable:$true] %s61_s8 }
  0x27   :  { %s1299_s13 = scalar_lea.hbm %s1538_s3, 1024 }
  0x28   :  { %p1300_p2 = scmp.ne.s32.totalorder %s1538_s3, %s1299_s13  ;;  %p1303_p3 = scmp.lt.u32.totalorder %s1299_s13, %s1538_s3 }
  0x2a   :  { %p1305_p4 = pnand %p1303_p3, %p1300_p2 }
  0x2c   :  { %1308 = shalt.err (!%p1305_p4)
}
  0x2d   :  { %s1309_s0 = scalar_lea.vmem %s48_s29, 1024  ;;  %p1314_p6 = scmp.lt.s32.totalorder %s48_s29, %s48_s29 }
  0x2e   :  { %p1310_p5 = scmp.ne.s32.totalorder %s48_s29, %s1309_s0  ;;  %p1315_p7 = scmp.lt.s32.totalorder %s1309_s0, %s1309_s0 }
  0x30   :  { %p1316_p8 = por %p1315_p7, %p1314_p6 }
  0x32   :  { %p1317_p9 = pnand %p1316_p8, %p1310_p5 }
  0x34   :  { %1320 = shalt.err (!%p1317_p9)
}
  0x35   :  { %53 = dma.hbm_to_vmem [thread:$0]  %s1538_s3, 1024, %s48_s29, [#allocation6], %s1374_s11, %s1374_s11, %s1375_s12  }
  0x36   :  { %s1321_s22 = scalar_lea.hbm %s1540_s5, 1024 }
  0x37   :  { %p1322_p10 = scmp.ne.s32.totalorder %s1540_s5, %s1321_s22  ;;  %p1325_p11 = scmp.lt.u32.totalorder %s1321_s22, %s1540_s5 }
  0x39   :  { %p1327_p12 = pnand %p1325_p11, %p1322_p10 }
  0x3b   :  { %1330 = shalt.err (!%p1327_p12)
}
  0x3c   :  { %s1331_s26 = scalar_lea.vmem %s1451_s8, 1024  ;;  %p1336_p0 = scmp.lt.s32.totalorder %s1451_s8, %s1451_s8 }
  0x3d   :  { %p1332_p13 = scmp.ne.s32.totalorder %s1451_s8, %s1331_s26  ;;  %p1337_p1 = scmp.lt.s32.totalorder %s1331_s26, %s1331_s26 }
  0x3f   :  { %p1338_p2 = por %p1337_p1, %p1336_p0 }
  0x41   :  { %p1339_p3 = pnand %p1338_p2, %p1332_p13 }
  0x43   :  { %1342 = shalt.err (!%p1339_p3)
}
  0x44   :  { %67 = dma.hbm_to_vmem [thread:$0]  %s1540_s5, 1024, %s1451_s8, [#allocation9], %s1374_s11, %s1374_s11, %s1375_s12  }
  0x45   :  { %1365 = dma.done.wait [#allocation3], 896  }
  0x46   :  { %1366 = vsyncadd [#allocation3], 4294966400 }
  0x47   :  { %1367 = dma.done.wait [#allocation6], 7296  }
  0x48   :  { %1368 = vsyncadd [#allocation6], 4294960000 }
  0x49   :  { %1369 = dma.done.wait [#allocation9], 1024  }
  0x4a   :  { %1370 = vsyncadd [#allocation9], 4294966272  ;;  %v1180_v0 = vld [vmem:[#allocation5 + $0x40] sm:$0xff]   ;;  %v1184_v4 = vld [vmem:[#allocation5 + $0x48] sm:$0xff]   ;;  %v1381_v38 = vmov 0.0   ;;  %vm1382_vm0 = vmmov 0  }
  0x4b   :  { %v1181_v1 = vld [vmem:[#allocation5] sm:$0xff]   ;;  %1037 = vmatprep.subr.bf16.mxu0 %v1180_v0  ;;  %v1185_v5 = vld [vmem:[#allocation5 + $0x8] sm:$0xff]   ;;  %v1188_v8 = vld [vmem:[#allocation5 + $0x50] sm:$0xff]   ;;  %vm525_vm1 = vcmask 130048   ;;  %s1383_s9 = smov [#allocation10]  }
  0x4c   :  { %v1182_v2 = vld [vmem:[#allocation5 + $0xc0] sm:$0xff]   ;;  %1038 = vmatpush3.bf16.msra.mxu0 %v1181_v1  ;;  %v1186_v6 = vld [vmem:[#allocation5 + $0xc8] sm:$0xff]   ;;  %v1189_v9 = vld [vmem:[#allocation5 + $0x10] sm:$0xff]   ;;  %s938_s10 = sshll.u32 %s1383_s9, 4  ;;  %s939_s10 = int_to_ptr.vmem [resolvable:$true] %s938_s10 }
  0x4d   :  { %v1183_v3 = vld [vmem:[#allocation5 + $0x80] sm:$0xff]   ;;  %1059 = vmatprep.subr.bf16.mxu1 %v1182_v2  ;;  %1039 = vmatprep.subr.bf16.mxu0 %v1184_v4  ;;  %v1187_v7 = vld [vmem:[#allocation5 + $0x88] sm:$0xff]   ;;  %v1190_v10 = vld [vmem:[#allocation5 + $0xd0] sm:$0xff]   ;;  %p1348_p5 = scmp.lt.s32.totalorder %s939_s10, %s939_s10 }
  0x4e   :  { %1060 = vmatpush3.bf16.msra.mxu1 %v1183_v3  ;;  %v1191_v11 = vld [vmem:[#allocation5 + $0x90] sm:$0xff]   ;;  %v1192_v12 = vld [vmem:[#allocation5 + $0x58] sm:$0xff]   ;;  %v1196_v16 = vld [vmem:[#allocation5 + $0x60] sm:$0xff]  }
  0x4f   :  { %1061 = vmatprep.subr.bf16.mxu1 %v1186_v6  ;;  %v1193_v13 = vld [vmem:[#allocation5 + $0x18] sm:$0xff]   ;;  %v1197_v17 = vld [vmem:[#allocation5 + $0x20] sm:$0xff]   ;;  %v1200_v20 = vld [vmem:[#allocation5 + $0x68] sm:$0xff]  }
  0x50   :  { %1040 = vmatpush3.bf16.msra.mxu0 %v1185_v5  ;;  %v1194_v14 = vld [vmem:[#allocation5 + $0xd8] sm:$0xff]   ;;  %v1198_v18 = vld [vmem:[#allocation5 + $0xe0] sm:$0xff]   ;;  %v1201_v21 = vld [vmem:[#allocation5 + $0x28] sm:$0xff]  }
  0x51   :  { %1041 = vmatprep.subr.bf16.mxu0 %v1188_v8  ;;  %v1195_v15 = vld [vmem:[#allocation5 + $0x98] sm:$0xff]   ;;  %v1199_v19 = vld [vmem:[#allocation5 + $0xa0] sm:$0xff]   ;;  %v1202_v22 = vld [vmem:[#allocation5 + $0xe8] sm:$0xff]  }
  0x52   :  { %1062 = vmatpush3.bf16.msra.mxu1 %v1187_v7  ;;  %v1203_v23 = vld [vmem:[#allocation5 + $0xa8] sm:$0xff]   ;;  %v1204_v24 = vld [vmem:[#allocation5 + $0x70] sm:$0xff]   ;;  %v1208_v28 = vld [vmem:[#allocation5 + $0x78] sm:$0xff]  }
  0x53   :  { %1063 = vmatprep.subr.bf16.mxu1 %v1190_v10  ;;  %v1205_v25 = vld [vmem:[#allocation5 + $0x30] sm:$0xff]   ;;  %v1209_v29 = vld [vmem:[#allocation5 + $0x38] sm:$0xff]   ;;  %v1211_v31 = vld [vmem:[#allocation2] ss:$28 sps:$4 sm:$0xff]  }
  0x54   :  { %1042 = vmatpush3.bf16.msra.mxu0 %v1189_v9  ;;  %v1206_v26 = vld [vmem:[#allocation5 + $0xf0] sm:$0xff]   ;;  %v1210_v30 = vld [vmem:[#allocation5 + $0xf8] sm:$0xff]   ;;  %v1213_v32 = vld [vmem:[#allocation2 + $0x4] ss:$28 sps:$4 sm:$0xff]  }
  0x55   :  { %1043 = vmatprep.subr.bf16.mxu0 %v1192_v12  ;;  %v1207_v27 = vld [vmem:[#allocation5 + $0xb0] sm:$0xff]   ;;  %v1214_v33 = vld [vmem:[#allocation5 + $0xb8] sm:$0xff]   ;;  %561 = vmatprep.mubr.bf16.mxu0 %v1213_v32  ;;  %v1215_v34 = vld [vmem:[#allocation5 + $0x140] sm:$0xff]  }
  0x56   :  { %1064 = vmatpush3.bf16.msra.mxu1 %v1191_v11  ;;  %v1216_v35 = vld [vmem:[#allocation2 + $0x8] ss:$28 sps:$4 sm:$0xff]   ;;  %v1219_v37 = vld [vmem:[#allocation5 + $0x100] sm:$0xff]   ;;  %v1224_v43 = vld [vmem:[#allocation5 + $0x158] sm:$0xff]  }
  0x57   :  { %1065 = vmatprep.subr.bf16.mxu1 %v1194_v14  ;;  %v1218_v36 = vld [vmem:[#allocation2 + $0xc] ss:$28 sps:$4 sm:$0xff]   ;;  %v1220_v39 = vld [vmem:[#allocation5 + $0x148] sm:$0xff]   ;;  %v1225_v44 = vld [vmem:[#allocation5 + $0x118] sm:$0xff]  }
  0x58   :  { %1044 = vmatpush3.bf16.msra.mxu0 %v1193_v13  ;;  %602 = vmatprep.mubr.bf16.mxu1 %v1218_v36  ;;  %v1221_v40 = vld [vmem:[#allocation5 + $0x108] sm:$0xff]   ;;  %v1222_v41 = vld [vmem:[#allocation5 + $0x150] sm:$0xff]   ;;  %v1226_v45 = vld [vmem:[#allocation5 + $0x160] sm:$0xff]  }
  0x59   :  { %1045 = vmatprep.subr.bf16.mxu0 %v1196_v16  ;;  %v1223_v42 = vld [vmem:[#allocation5 + $0x110] sm:$0xff]   ;;  %v1227_v46 = vld [vmem:[#allocation5 + $0x120] sm:$0xff]   ;;  %v1228_v47 = vld [vmem:[#allocation5 + $0x168] sm:$0xff]  }
  0x5a   :  { %1066 = vmatpush3.bf16.msra.mxu1 %v1195_v15  ;;  %v1234_v48 = vld [vmem:[#allocation5 + $0x180] sm:$0xff]   ;;  %v1229_v49 = vld [vmem:[#allocation5 + $0x128] sm:$0xff]   ;;  %v1237_v50 = vld [vmem:[#allocation2 + $0x14] ss:$28 sps:$4 sm:$0xff]  }
  0x5b   :  { %1067 = vmatprep.subr.bf16.mxu1 %v1198_v18  ;;  %v1230_v51 = vld [vmem:[#allocation5 + $0x170] sm:$0xff]   ;;  %v1238_v52 = vld [vmem:[#allocation2 + $0x18] ss:$28 sps:$4 sm:$0xff]   ;;  %v1239_v57 = vld [vmem:[#allocation7] sm:$0xff]  }
  0x5c   :  { %1046 = vmatpush3.bf16.msra.mxu0 %v1197_v17  ;;  %v1231_v53 = vld [vmem:[#allocation5 + $0x130] sm:$0xff]   ;;  %v1232_v54 = vld [vmem:[#allocation5 + $0x178] sm:$0xff]   ;;  %v1242_v60 = vld [vmem:[#allocation7 + $0x18] sm:$0xff]  }
  0x5d   :  { %1047 = vmatprep.subr.bf16.mxu0 %v1200_v20  ;;  %v1233_v55 = vld [vmem:[#allocation5 + $0x138] sm:$0xff]   ;;  %v1240_v58 = vld [vmem:[#allocation7 + $0x8] sm:$0xff]   ;;  %v1243_v61 = vld [vmem:[#allocation7 + $0x20] sm:$0xff]  }
  0x5e   :  { %1068 = vmatpush3.bf16.msra.mxu1 %v1199_v19  ;;  %v1235_v56 = vld [vmem:[#allocation2 + $0x10] ss:$28 sps:$4 sm:$0xff]   ;;  %v1246_v0 = vld [vmem:[#allocation7 + $0x38] sm:$0xff]   ;;  %v1247_v1 = vld [vmem:[#allocation8] sm:$0xff]  }
  0x5f   :  { %1069 = vmatprep.subr.bf16.mxu1 %v1202_v22  ;;  %v1241_v59 = vld [vmem:[#allocation7 + $0x10] sm:$0xff]   ;;  %v1244_v62 = vld [vmem:[#allocation7 + $0x28] sm:$0xff]   ;;  %v1250_v4 = vld [vmem:[#allocation8 + $0x18] sm:$0xff]  }
  0x60   :  { %1048 = vmatpush3.bf16.msra.mxu0 %v1201_v21  ;;  %v1245_v63 = vld [vmem:[#allocation7 + $0x30] sm:$0xff]   ;;  %v1248_v2 = vld [vmem:[#allocation8 + $0x8] sm:$0xff]   ;;  %v1251_v5 = vld [vmem:[#allocation8 + $0x20] sm:$0xff]  }
  0x61   :  { %1049 = vmatprep.subr.bf16.mxu0 %v1204_v24  ;;  %v1249_v3 = vld [vmem:[#allocation8 + $0x10] sm:$0xff]   ;;  %v1252_v6 = vld [vmem:[#allocation8 + $0x28] sm:$0xff]   ;;  %v952_v8 = vld [vmem:[%s1537_s2] ss:$0 sm:$0xff] }
  0x62   :  { %1070 = vmatpush3.bf16.msra.mxu1 %v1203_v23 }
  0x63   :  { %1071 = vmatprep.subr.bf16.mxu1 %v1206_v26 }
  0x64   :  { %1050 = vmatpush3.bf16.msra.mxu0 %v1205_v25 }
  0x65   :  { %1051 = vmatprep.subr.bf16.mxu0 %v1208_v28 }
  0x66   :  { %1072 = vmatpush3.bf16.msra.mxu1 %v1207_v27 }
  0x67   :  { %1073 = vmatprep.subr.bf16.mxu1 %v1210_v30 }
  0x68   :  { %1052 = vmatpush3.bf16.msra.mxu0 %v1209_v29 }
  0x69   :  { %1081 = vmatprep.subr.bf16.mxu0 %v1215_v34 }
  0x6a   :  { %1074 = vmatpush3.bf16.msra.mxu1 %v1214_v33 }
  0x6b   :  { %562 = vmatmul.mubr.bf16.vlgmr.msra.gmra.mrb[0].mxu0 %v1211_v31  ;;  %1123 = vmatprep.subr.bf16.mxu1 %v1381_v38 }
  0x6c   :  { %1082 = vmatpush3.bf16.msra.mxu0 %v1219_v37  ;;  %643 = vmatprep.mubr.bf16.mxu0 %v1237_v50 }
  0x6d   :  { %603 = vmatmul.mubr.bf16.vlgmr.msra.gmra.mrb[0].mxu1 %v1216_v35  ;;  %1083 = vmatprep.subr.bf16.mxu0 %v1220_v39 }
  0x6e   :  { %1125 = vmatprep.mubr.msk.bf16.mxu1 %vm1382_vm0, %v1381_v38  ;;  %1124 = vmatpush3.bf16.msra.mxu1 %v1234_v48 }
  0x6f   :  { %1129 = vmatprep.subr.bf16.mxu1 %v1381_v38 }
  0x70   :  { %1084 = vmatpush3.bf16.msra.mxu0 %v1221_v40 }
  0x71   :  { %1085 = vmatprep.subr.bf16.mxu0 %v1222_v41 }
  0x74   :  { %1086 = vmatpush3.bf16.msra.mxu0 %v1223_v42  ;;  %v1253_v42 = vld [vmem:[#allocation8 + $0x30] sm:$0xff]  }
  0x75   :  { %1087 = vmatprep.subr.bf16.mxu0 %v1224_v43  ;;  %1126 = vmatmul.mubr.msk.bf16.vlgmr.msra.gmra.mrb[4].mxu1 %vm525_vm1, %v1238_v52  ;;  %v1254_v43 = vld [vmem:[#allocation8 + $0x38] sm:$0xff]  }
  0x76   :  { %1145 = vmatprep.mubr.msk.bf16.mxu1 %vm1382_vm0, %v1381_v38  ;;  %1130 = vmatpush3.bf16.msra.mxu1 %v1239_v57 }
  0x77   :  { %1131 = vmatprep.subr.bf16.mxu1 %v1381_v38 }
  0x78   :  { %1088 = vmatpush3.bf16.msra.mxu0 %v1225_v44  ;;  %v1010_v44 = vld [vmem:[%s1539_s4] ss:$0 sm:$0xff]  ;;  %s1343_s4 = scalar_lea.vmem %s939_s10, 128 }
  0x79   :  { %1089 = vmatprep.subr.bf16.mxu0 %v1226_v45  ;;  %p1344_p4 = scmp.ne.s32.totalorder %s939_s10, %s1343_s4  ;;  %p1349_p6 = scmp.lt.s32.totalorder %s1343_s4, %s1343_s4 }
  0x7a   :  { %1132 = vmatpush3.bf16.msra.mxu1 %v1240_v58 }
  0x7b   :  { %1133 = vmatprep.subr.bf16.mxu1 %v1381_v38  ;;  %p1350_p7 = por %p1349_p6, %p1348_p5 }
  0x7c   :  { %1090 = vmatpush3.bf16.msra.mxu0 %v1227_v46 }
  0x7d   :  { %1091 = vmatprep.subr.bf16.mxu0 %v1228_v47  ;;  %p1351_p8 = pnand %p1350_p7, %p1344_p4 }
  0x7e   :  { %1134 = vmatpush3.bf16.msra.mxu1 %v1241_v59 }
  0x7f   :  { %1135 = vmatprep.subr.bf16.mxu1 %v1381_v38 }
  0x80   :  { %1092 = vmatpush3.bf16.msra.mxu0 %v1229_v49 }
  0x81   :  { %1093 = vmatprep.subr.bf16.mxu0 %v1230_v51 }
  0x82   :  { %1136 = vmatpush3.bf16.msra.mxu1 %v1242_v60 }
  0x83   :  { %1137 = vmatprep.subr.bf16.mxu1 %v1381_v38 }
  0x84   :  { %1094 = vmatpush3.bf16.msra.mxu0 %v1231_v53 }
  0x85   :  { %1095 = vmatprep.subr.bf16.mxu0 %v1232_v54 }
  0x86   :  { %1138 = vmatpush3.bf16.msra.mxu1 %v1243_v61 }
  0x87   :  { %1139 = vmatprep.subr.bf16.mxu1 %v1381_v38 }
  0x88   :  { %1096 = vmatpush3.bf16.msra.mxu0 %v1233_v55 }
  0x89   :  { %1149 = vmatprep.subr.bf16.mxu0 %v1381_v38 }
  0x8a   :  { %1140 = vmatpush3.bf16.msra.mxu1 %v1244_v62 }
  0x8b   :  { %644 = vmatmul.mubr.bf16.vlgmr.msra.gmra.mrb[4].mxu0 %v1235_v56  ;;  %1141 = vmatprep.subr.bf16.mxu1 %v1381_v38 }
  0x8c   :  { %1165 = vmatprep.mubr.msk.bf16.mxu0 %vm1382_vm0, %v1381_v38  ;;  %1150 = vmatpush3.bf16.msra.mxu0 %v1247_v1 }
  0x8d   :  { %1151 = vmatprep.subr.bf16.mxu0 %v1381_v38 }
  0x8e   :  { %1142 = vmatpush3.bf16.msra.mxu1 %v1245_v63 }
  0x8f   :  { %1143 = vmatprep.subr.bf16.mxu1 %v1381_v38 }
  0x90   :  { %1152 = vmatpush3.bf16.msra.mxu0 %v1248_v2 }
  0x91   :  { %1153 = vmatprep.subr.bf16.mxu0 %v1381_v38 }
  0x92   :  { %1144 = vmatpush3.bf16.msra.mxu1 %v1246_v0 }
  0x94   :  { %1154 = vmatpush3.bf16.msra.mxu0 %v1249_v3 }
  0x95   :  { %1155 = vmatprep.subr.bf16.mxu0 %v1381_v38 }
  0x98   :  { %1156 = vmatpush3.bf16.msra.mxu0 %v1250_v4 }
  0x99   :  { %1157 = vmatprep.subr.bf16.mxu0 %v1381_v38 }
  0x9c   :  { %1158 = vmatpush3.bf16.msra.mxu0 %v1251_v5 }
  0x9d   :  { %1159 = vmatprep.subr.bf16.mxu0 %v1381_v38 }
  0xa0   :  { %1160 = vmatpush3.bf16.msra.mxu0 %v1252_v6 }
  0xa1   :  { %1161 = vmatprep.subr.bf16.mxu0 %v1381_v38 }
  0xa4   :  { %1162 = vmatpush3.bf16.msra.mxu0 %v1253_v42 }
  0xa5   :  { %1163 = vmatprep.subr.bf16.mxu0 %v1381_v38  ;;  %v1019_v38 = vld [vmem:[%s1541_s6] ss:$0 sm:$0xff] }
  0xa8   :  { %1164 = vmatpush3.bf16.msra.mxu0 %v1254_v43 }
 0x13e   :  { %v1053_v7 = vpop.f32.mrb[0].mxu0 }
 0x13f   :  { %v1054_v9 = vpop.f32.mrb[1].mxu0 }
 0x140   :  { %v1055_v10 = vadd.f32 %v1054_v9, %v1053_v7  ;;  %v1056_v11 = vpop.f32.mrb[2].mxu0  ;;  %v1075_v12 = vpop.f32.mrb[0].mxu1 }
 0x141   :  { %v1057_v13 = vpop.f32.mrb[3].mxu0  ;;  %v1076_v16 = vpop.f32.mrb[1].mxu1 }
 0x142   :  { %v564_v14 = vadd.f32 %v1055_v10, %v952_v8  ;;  %v1058_v15 = vadd.f32 %v1057_v13, %v1056_v11  ;;  %v1077_v17 = vadd.f32 %v1076_v16, %v1075_v12  ;;  %v1078_v18 = vpop.f32.mrb[2].mxu1 }
 0x143   :  { %v1079_v20 = vpop.f32.mrb[3].mxu1 }
 0x144   :  { %v567_v19 = vadd.f32 %v1058_v15, %v952_v8  ;;  %v605_v21 = vadd.f32 %v1077_v17, %v564_v14  ;;  %v1080_v22 = vadd.f32 %v1079_v20, %v1078_v18 }
 0x146   :  { %v608_v23 = vadd.f32 %v1080_v22, %v567_v19 }
 0x148   :  { %v686_v24 = vpop.f32.mrb[4].mxu1 }
 0x149   :  { %v1127_v25 = vpop.f32.mrb[5].mxu1 }
 0x14a   :  { %v689_v26 = vpop.f32.mrb[6].mxu1 }
 0x14b   :  { %v1128_v27 = vpop.f32.mrb[7].mxu1 }
 0x15e   :  { %v1097_v28 = vpop.f32.mrb[4].mxu0 }
 0x15f   :  { %v1098_v29 = vpop.f32.mrb[5].mxu0 }
 0x160   :  { %v1099_v30 = vadd.f32 %v1098_v29, %v1097_v28  ;;  %v1100_v31 = vpop.f32.mrb[6].mxu0 }
 0x161   :  { %v1101_v32 = vpop.f32.mrb[7].mxu0 }
 0x162   :  { %v646_v33 = vadd.f32 %v1099_v30, %v605_v21  ;;  %v1102_v34 = vadd.f32 %v1101_v32, %v1100_v31 }
 0x164   :  { %v687_v35 = vadd.f32 %v686_v24, %v646_v33  ;;  %v649_v36 = vadd.f32 %v1102_v34, %v608_v23 }
 0x166   :  { %v690_v37 = vadd.f32 %v689_v26, %v649_v36  ;;  %v693_v39 = vmax.f32 %v687_v35, 0.0 }
 0x168   :  { %v694_v40 = vmax.f32 %v690_v37, 0.0 }
 0x16a   :  { %v695_v41 = vpack.c.bf16 %v694_v40, %v693_v39 }
 0x16c   :  { %1146 = vmatmul.mubr.bf16.vlgmr.msra.gmra.mrb[8].mxu1 %v695_v41 }
 0x23f   :  { %v801_v45 = vpop.f32.mrb[8].mxu1 }
 0x240   :  { %v802_v46 = vadd.f32 %v1010_v44, %v801_v45  ;;  %v1147_v47 = vpop.f32.mrb[9].mxu1 }
 0x241   :  { %v804_v48 = vpop.f32.mrb[10].mxu1 }
 0x242   :  { %v805_v49 = vadd.f32 %v1010_v44, %v804_v48  ;;  %v1148_v50 = vpop.f32.mrb[11].mxu1  ;;  %v808_v51 = vmax.f32 %v802_v46, 0.0 }
 0x244   :  { %v809_v52 = vmax.f32 %v805_v49, 0.0 }
 0x246   :  { %v810_v53 = vpack.c.bf16 %v809_v52, %v808_v51 }
 0x248   :  { %1166 = vmatmul.mubr.bf16.vlgmr.msra.gmra.mrb[8].mxu0 %v810_v53 }
 0x31b   :  { %v916_v54 = vpop.f32.mrb[8].mxu0 }
 0x31c   :  { %v1167_v55 = vpop.f32.mrb[9].mxu0  ;;  %v917_v57 = vadd.f32 %v1019_v38, %v916_v54 }
 0x31d   :  { %v919_v56 = vpop.f32.mrb[10].mxu0 }
 0x31e   :  { %v920_v58 = vadd.f32 %v1019_v38, %v919_v56  ;;  %v1168_v59 = vpop.f32.mrb[11].mxu0 }
 0x320   :  { %v1035_v60 = vpack.c.bf16 %v920_v58, %v917_v57 }
 0x322   :  { %1036 = vst [vmem:[#allocation10] sm:$0xff] %v1035_v60  }
 0x323   :  { %1354 = shalt.err (!%p1351_p8)
}
 0x324   :  { %s1355_s14 = scalar_lea.hbm %s1542_s7, 128 }
 0x325   :  { %p1356_p9 = scmp.ne.s32.totalorder %s1542_s7, %s1355_s14  ;;  %p1359_p10 = scmp.lt.u32.totalorder %s1355_s14, %s1542_s7 }
 0x327   :  { %p1361_p11 = pnand %p1359_p10, %p1356_p9 }
 0x329   :  { %1364 = shalt.err (!%p1361_p11)
}
 0x32a   :  { %944 = dma.vmem_to_hbm [thread:$0]  %s939_s10, 128, %s1542_s7, [#allocation4], %s1374_s11, %s1374_s11, %s1375_s12  }
 0x32b   :  { %1371 = dma.done.wait [#allocation4], 128  }
 0x32c   :  { %1372 = vsyncadd [#allocation4], 4294967168 }
 0x32d   :  { %948 = vsyncpa [#allocation3], 1 }
 0x32e   :  { %949 = vsyncpa [#allocation6], 1 }
 0x32f   :  { %950 = vsyncpa [#allocation9], 1 }
 0x330   :  { %951 = vsyncpa [#allocation4], 1 }

</bundles_post_ra>
